<compile_context>
chip_gen: v7x
topology: tpu7x:2x2x1
jax: 0.10.0
libtpu: 0.0.40
codegen_flags: <defaults>
</compile_context>

<pallas_src>
import functools

import jax
import jax.numpy as jnp
from jax import lax
from jax.experimental import pallas as pl
from jax.experimental.pallas import tpu as pltpu


_LANE = 128                            # lane-dense last-dim tiles
_SUBLANE = 8                           # sublane granularity for row tiles
_TARGET_BLOCK_BYTES = 2 * 1024 * 1024  # ~1-4 MiB blocks reach ~85% of HBM roofline


def _round_up(n: int, m: int) -> int:
    return ((n + m - 1) // m) * m


def _physical_vmem_bytes() -> int:
    """Per-TensorCore VMEM; conservative fallback is v7x's 64 MiB."""
    try:
        info = pltpu.get_tpu_info()
        cap = getattr(info, "vmem_capacity_bytes", None)
        if cap:
            return int(cap)
    except Exception:  # query is best-effort / generation dependent
        pass
    return 64 * 1024 * 1024


# ---------------------------------------------------------------------------
# Kernels
# ---------------------------------------------------------------------------
def _softmax_dim0_kernel(x_ref, o_ref):
    """One column tile, full row extent: numerically stable softmax along axis 0."""
    x = x_ref[...].astype(jnp.float32)
    m = jnp.max(x, axis=0, keepdims=True)
    e = jnp.exp(x - m)
    s = jnp.sum(e, axis=0, keepdims=True)
    # Exact division: the kernel is HBM-bandwidth bound, so the divide is hidden
    # for free and the result matches torch.nn.Softmax to f32 rounding.
    o_ref[...] = (e / s).astype(o_ref.dtype)


def _colstats_kernel(x_ref, m_ref, l_ref, m_sc, l_sc, *, rows, row_tile):
    """Tall-path pass 1: online per-column running max / sum-of-exp over row tiles."""
    r = pl.program_id(1)  # row axis is last ("arbitrary")

    @pl.when(r == 0)
    def _init():
        m_sc[...] = jnp.full_like(m_sc, -jnp.inf)
        l_sc[...] = jnp.zeros_like(l_sc)

    x = x_ref[...].astype(jnp.float32)
    if rows % row_tile != 0:
        # Static in-kernel mask for the ragged row edge (no host-side padding).
        row_idx = r * row_tile + lax.broadcasted_iota(jnp.int32, x.shape, 0)
        x = jnp.where(row_idx < rows, x, -jnp.inf)

    m_blk = jnp.max(x, axis=0, keepdims=True)
    m_new = jnp.maximum(m_sc[...], m_blk)
    alpha = jnp.exp(m_sc[...] - m_new)
    l_sc[...] = alpha * l_sc[...] + jnp.sum(jnp.exp(x - m_new), axis=0, keepdims=True)
    m_sc[...] = m_new

    @pl.when(r == pl.num_programs(1) - 1)
    def _finalize():
        m_ref[...] = m_sc[...]
        l_ref[...] = l_sc[...]


def _normalize_kernel(x_ref, m_ref, l_ref, o_ref):
    """Tall-path pass 2: out = exp(x - m) / l (purely elementwise)."""
    x = x_ref[...].astype(jnp.float32)
    o_ref[...] = (jnp.exp(x - m_ref[...]) / l_ref[...]).astype(o_ref.dtype)


# ---------------------------------------------------------------------------
# Wrapper
# ---------------------------------------------------------------------------
def softmax_dim0(x: jax.Array, *, allow_xla_fast_path: bool = True,
                 force_row_tile=None) -> jax.Array:
    """Softmax over axis 0 of a 2D array (== torch.nn.Softmax(dim=0))."""
    assert x.ndim == 2, "SoftmaxModule example input is 2D"
    rows, cols = x.shape
    itemsize = jnp.dtype(x.dtype).itemsize

    # Tiny inputs: pallas_call dispatch overhead dwarfs the work.
    if allow_xla_fast_path and force_row_tile is None and rows * cols < _SUBLANE * _LANE:
        return jax.nn.softmax(x, axis=0)

    # Generation-aware VMEM budgeting (v7x: 64 MiB, v5e/v6e: 128 MiB physical).
    phys_vmem = _physical_vmem_bytes()
    vmem_limit = min(int(phys_vmem * 0.7), 100 * 1024 * 1024)
    # Live VMEM bytes per block element in the single-pass kernel:
    #   double-buffered input + output (x.dtype) plus f32 intermediates (x, e, out).
    per_elem = 2 * (itemsize + itemsize) + 3 * 4
    max_block_elems = max((vmem_limit * 3 // 4) // per_elem, _SUBLANE * _LANE)

    def pick_col_tile(rows_per_block):
        """Lane-dense column tile targeting ~_TARGET_BLOCK_BYTES per block."""
        if cols <= _LANE:
            return cols, 1                        # full-extent last dim
        n128 = pl.cdiv(cols, _LANE)
        bytes_per_strip = max(rows_per_block, 1) * _LANE * max(itemsize, 4)
        strips = min(n128, max(1, _TARGET_BLOCK_BYTES // bytes_per_strip))
        if n128 >= 2:
            # >= 2 column tiles so both v7x TensorCores get work (neutral on v5e/v6e).
            strips = min(strips, pl.cdiv(n128, 2))
        while strips > 1 and rows_per_block * strips * _LANE > max_block_elems:
            strips -= 1
        tile_c = max(strips, 1) * _LANE
        return tile_c, pl.cdiv(cols, tile_c)

    use_tall = (force_row_tile is not None
                or rows * min(cols, _LANE) > max_block_elems)

    if not use_tall:
        # Single pass: whole column (all rows) resident per block.
        tile_c, grid_c = pick_col_tile(rows)
        return pl.pallas_call(
            _softmax_dim0_kernel,
            out_shape=jax.ShapeDtypeStruct((rows, cols), x.dtype),
            grid_spec=pltpu.PrefetchScalarGridSpec(
                num_scalar_prefetch=0,
                grid=(grid_c,),
                in_specs=[pl.BlockSpec((rows, tile_c), lambda j: (0, j))],
                out_specs=pl.BlockSpec((rows, tile_c), lambda j: (0, j)),
            ),
            compiler_params=pltpu.CompilerParams(
                dimension_semantics=("parallel",),
                vmem_limit_bytes=vmem_limit,
            ),
        )(x)

    # Tall path: two passes with row tiling (bounded VMEM; ~1.5x HBM traffic).
    tile_c, grid_c = pick_col_tile(min(rows, 512))
    if force_row_tile is not None:
        row_tile = max(_SUBLANE, _round_up(int(force_row_tile), _SUBLANE))
    else:
        row_tile = max(_SUBLANE, ((max_block_elems // tile_c) // _SUBLANE) * _SUBLANE)
    row_tile = min(row_tile, _round_up(rows, _SUBLANE))
    grid_r = pl.cdiv(rows, row_tile)

    m_stats, l_stats = pl.pallas_call(
        functools.partial(_colstats_kernel, rows=rows, row_tile=row_tile),
        out_shape=(jax.ShapeDtypeStruct((1, cols), jnp.float32),
                   jax.ShapeDtypeStruct((1, cols), jnp.float32)),
        grid_spec=pltpu.PrefetchScalarGridSpec(
            num_scalar_prefetch=0,
            grid=(grid_c, grid_r),
            in_specs=[pl.BlockSpec((row_tile, tile_c), lambda j, r: (r, j))],
            out_specs=(pl.BlockSpec((1, tile_c), lambda j, r: (0, j)),
                       pl.BlockSpec((1, tile_c), lambda j, r: (0, j))),
            scratch_shapes=[pltpu.VMEM((1, tile_c), jnp.float32),
                            pltpu.VMEM((1, tile_c), jnp.float32)],
        ),
        compiler_params=pltpu.CompilerParams(
            dimension_semantics=("parallel", "arbitrary"),
            vmem_limit_bytes=vmem_limit,
        ),
    )(x)

    return pl.pallas_call(
        _normalize_kernel,
        out_shape=jax.ShapeDtypeStruct((rows, cols), x.dtype),
        grid_spec=pltpu.PrefetchScalarGridSpec(
            num_scalar_prefetch=0,
            grid=(grid_c, grid_r),
            in_specs=[pl.BlockSpec((row_tile, tile_c), lambda j, r: (r, j)),
                      pl.BlockSpec((1, tile_c), lambda j, r: (0, j)),
                      pl.BlockSpec((1, tile_c), lambda j, r: (0, j))],
            out_specs=pl.BlockSpec((row_tile, tile_c), lambda j, r: (r, j)),
        ),
        compiler_params=pltpu.CompilerParams(
            dimension_semantics=("parallel", "parallel"),
            vmem_limit_bytes=vmem_limit,
        ),
    )(x, m_stats, l_stats)


if __name__ == "__main__":
    key = jax.random.PRNGKey(0)
    k1, k2, k3, k4 = jax.random.split(key, 4)

    def check(out, x, name, atol=1e-6, rtol=1e-6):
        ref = jax.nn.softmax(x, axis=0)
        assert out.shape == x.shape and out.dtype == x.dtype, name
        assert jnp.allclose(out, ref, atol=atol, rtol=rtol), f"mismatch: {name}"

    # 1) The module's example input torch.ones(2, 2), forced through Pallas
    #    (single block equal to the full array; no padding anywhere).
    x_ones = jnp.ones((2, 2), dtype=jnp.float32)
    out_ones = jax.block_until_ready(softmax_dim0(x_ones, allow_xla_fast_path=False))
    check(out_ones, x_ones, "ones(2,2)")

    # 2) Random (2, 2), still forced through the Pallas path.
    x_small = jax.random.normal(k1, (2, 2), dtype=jnp.float32)
    out_small = jax.block_until_ready(softmax_dim0(x_small, allow_xla_fast_path=False))
    check(out_small, x_small, "(2,2)")

    # 3) Ragged shape (rows % 8 != 0, cols % 128 != 0): cdiv-grid edge handling,
    #    no host-side pad / slice copies.
    x_ragged = jax.random.normal(k2, (13, 300), dtype=jnp.float32)
    out_ragged = jax.block_until_ready(softmax_dim0(x_ragged))
    check(out_ragged, x_ragged, "(13,300)")

    # 4) Multi-tile column grid (>= 2 tiles so both v7x TensorCores are used).
    x_tiled = jax.random.normal(k3, (8, 1280), dtype=jnp.float32)
    out_tiled = jax.block_until_ready(softmax_dim0(x_tiled))
    check(out_tiled, x_tiled, "(8,1280)")

    # 5) Row-tiled two-pass path, forced at a small shape to exercise the code
    #    path that genuinely tall inputs (rows beyond the VMEM budget) take.
    x_tall = jax.random.normal(k4, (40, 384), dtype=jnp.float32)
    out_tall = jax.block_until_ready(softmax_dim0(x_tall, force_row_tile=16))
    check(out_tall, x_tall, "(40,384) row-tiled")

    print("KERNEL_OK")
</pallas_src>

<mosaic_0001>
module attributes {stable_mosaic.version = 11 : i64} {
  func.func @_softmax_dim0_kernel(%arg0: i32, %arg1: memref<2x2xf32, #tpu.memory_space<vmem>>, %arg2: memref<2x2xf32, #tpu.memory_space<vmem>>) attributes {dimension_semantics = [#tpu.dimension_semantics<parallel>], iteration_bounds = array<i64: 1>, scalar_prefetch = 0 : i64, scratch_operands = 0 : i64, tpu.core_type = #tpu.core_type<tc>, window_params = [{transform_indices = @transform_0, window_bounds = array<i64: 2, 2>}, {transform_indices = @transform_1, window_bounds = array<i64: 2, 2>}]} {
    %c0 = arith.constant 0 : index
    %c0_0 = arith.constant 0 : index
    %0 = vector.load %arg1[%c0, %c0_0] : memref<2x2xf32, #tpu.memory_space<vmem>>, vector<2x2xf32>
    %cst = arith.constant dense<0xFF800000> : vector<2xf32>
    %1 = vector.multi_reduction <maximumf>, %0, %cst [0] : vector<2x2xf32> to vector<2xf32>
    %2 = vector.shape_cast %1 : vector<2xf32> to vector<1x2xf32>
    %3 = vector.broadcast %2 : vector<1x2xf32> to vector<2x2xf32>
    %4 = arith.subf %0, %3 : vector<2x2xf32>
    %5 = math.exp %4 : vector<2x2xf32>
    %cst_1 = arith.constant dense<0.000000e+00> : vector<2xf32>
    %6 = vector.multi_reduction <add>, %5, %cst_1 [0] : vector<2x2xf32> to vector<2xf32>
    %7 = vector.shape_cast %6 : vector<2xf32> to vector<1x2xf32>
    %8 = vector.broadcast %7 : vector<1x2xf32> to vector<2x2xf32>
    %9 = arith.divf %5, %8 : vector<2x2xf32>
    %c0_2 = arith.constant 0 : index
    %c0_3 = arith.constant 0 : index
    %10 = vector.load %arg2[%c0_2, %c0_3] : memref<2x2xf32, #tpu.memory_space<vmem>>, vector<2x2xf32>
    tpu.vector_store %arg2[%c0_2, %c0_3], %9 {strides = array<i32>} : memref<2x2xf32, #tpu.memory_space<vmem>>, vector<2x2xf32>,
    return
  }
  func.func @transform_0(%arg0: i32) -> (i32, i32) {
    %c0_i32 = arith.constant 0 : i32
    %c0_i32_0 = arith.constant 0 : i32
    return %c0_i32, %arg0 : i32, i32
  }
  func.func @transform_1(%arg0: i32) -> (i32, i32) {
    %c0_i32 = arith.constant 0 : i32
    %c0_i32_0 = arith.constant 0 : i32
    return %c0_i32, %arg0 : i32, i32
  }
}

</mosaic_0001>

<bundles_post_ra>
// kernel: tpu_custom_call.1
= control target key start
LH: loop header
LB: loop body
LE: loop exit
PB: predicated region body
PF: predicated region fallthrough
CT: control target
= control target key end

     0   :  { %6 = vsyncpa [#allocation3], 0  ;;  %s151_s0 = inlined_call_operand.hbm [shape: f32[2,2], index: 0, kind: input, shape index: {}]   ;;  %s152_s1 = inlined_call_operand.hbm [shape: f32[2,2], index: 1, kind: output, shape index: {}]  }
   0x1   :  { %7 = vsyncpa [#allocation4], 0  ;;  %s112_s6 = smov [#allocation2]   ;;  %s64_s10 = scalar_lea.hbm %s151_s0, 32 }
   0x2   :  { %s14_s7 = sshll.u32 %s112_s6, 4  ;;  %p65_p0 = scmp.ne.s32.totalorder %s151_s0, %s64_s10  ;;  %s15_s7 = int_to_ptr.vmem [resolvable:$true] %s14_s7 }
   0x3   :  { %p68_p1 = scmp.lt.u32.totalorder %s64_s10, %s151_s0 }
   0x5   :  { %p70_p2 = pnand %p68_p1, %p65_p0 }
   0x7   :  { %73 = shalt.err (!%p70_p2)
}
   0x8   :  { %s74_s15 = scalar_lea.vmem %s15_s7, 32  ;;  %p79_p4 = scmp.lt.s32.totalorder %s15_s7, %s15_s7 }
   0x9   :  { %p75_p3 = scmp.ne.s32.totalorder %s15_s7, %s74_s15  ;;  %p80_p5 = scmp.lt.s32.totalorder %s74_s15, %s74_s15 }
   0xb   :  { %p81_p6 = por %p80_p5, %p79_p4 }
   0xd   :  { %p82_p7 = pnand %p81_p6, %p75_p3 }
   0xf   :  { %85 = shalt.err (!%p82_p7)
}
  0x10   :  { %17 = dma.hbm_to_vmem [thread:$0]  %s151_s0, 32, %s15_s7, [#allocation3]  }
  0x11   :  { %108 = dma.done.wait [#allocation3], 32  }
  0x12   :  { %109 = vsyncadd [#allocation3], 4294967264  ;;  %vm22_vm0 = vcmask 9216   ;;  %v21_v0 = vld [vmem:[#allocation2] sm:$0x3]  ;;  %s113_s0 = smov [#allocation5]  }
  0x13   :  { %v23_v1 = vsel %vm22_vm0, %v21_v0, -inf  ;;  %s49_s18 = sshll.u32 %s113_s0, 4  ;;  %s50_s18 = int_to_ptr.vmem [resolvable:$true] %s49_s18 }
  0x14   :  { %v24_v2 = vrot.slane %v23_v1, 4  ;;  %s86_s19 = scalar_lea.vmem %s50_s18, 32  ;;  %p91_p9 = scmp.lt.s32.totalorder %s50_s18, %s50_s18 }
  0x15   :  { %p87_p8 = scmp.ne.s32.totalorder %s50_s18, %s86_s19  ;;  %p92_p10 = scmp.lt.s32.totalorder %s86_s19, %s86_s19 }
  0x16   :  { %v25_v3 = vmax.f32 %v23_v1, %v24_v2 }
  0x17   :  { %p93_p11 = por %p92_p10, %p91_p9 }
  0x18   :  { %v26_v4 = vrot.slane %v25_v3, 2 }
  0x19   :  { %p94_p12 = pnand %p93_p11, %p87_p8 }
  0x1a   :  { %v27_v5 = vmax.f32 %v25_v3, %v26_v4 }
  0x1c   :  { %v28_v6 = vrot.slane %v27_v5, 1 }
  0x1e   :  { %v29_v7 = vmax.f32 %v27_v5, %v28_v6 }
  0x20   :  { %v30_v8 = vsub.f32 %v21_v0, %v29_v7 }
  0x22   :  { %v31_v9 = vmul.f32 1.442695, %v30_v8 }
  0x24   :  { %60 = vpow2.f32 %v31_v9 }
  0x2e   :  { %v61_v10 = vpop.eup %60 }
  0x2f   :  { %v33_v11 = vsel %vm22_vm0, %v61_v10, 0.0 }
  0x30   :  { %v34_v12 = vrot.slane %v33_v11, 4 }
  0x32   :  { %v35_v13 = vadd.f32 %v34_v12, %v33_v11 }
  0x34   :  { %v36_v14 = vrot.slane %v35_v13, 2 }
  0x36   :  { %v37_v15 = vadd.f32 %v36_v14, %v35_v13 }
  0x38   :  { %v38_v16 = vrot.slane %v37_v15, 1 }
  0x3a   :  { %v39_v17 = vadd.f32 %v38_v16, %v37_v15 }
  0x3c   :  { %62 = vrcp.f32 %v39_v17 }
  0x46   :  { %v63_v18 = vpop.eup %62 }
  0x47   :  { %v41_v19 = vmul.f32 %v63_v18, %v61_v10 }
  0x49   :  { %42 = vst.msk [vmem:[#allocation5] sm:$0x3] %vm22_vm0, %v41_v19 }
  0x4a   :  { %97 = shalt.err (!%p94_p12)
}
  0x4b   :  { %s98_s22 = scalar_lea.hbm %s152_s1, 32 }
  0x4c   :  { %p99_p13 = scmp.ne.s32.totalorder %s152_s1, %s98_s22  ;;  %p102_p0 = scmp.lt.u32.totalorder %s98_s22, %s152_s1 }
  0x4e   :  { %p104_p1 = pnand %p102_p0, %p99_p13 }
  0x50   :  { %107 = shalt.err (!%p104_p1)
}
  0x51   :  { %52 = dma.vmem_to_hbm [thread:$0]  %s50_s18, 32, %s152_s1, [#allocation4]  }
  0x52   :  { %110 = dma.done.wait [#allocation4], 32  }
  0x53   :  { %111 = vsyncadd [#allocation4], 4294967264 }
  0x54   :  { %56 = vsyncpa [#allocation3], 1 }
  0x55   :  { %57 = vsyncpa [#allocation4], 1 }

</bundles_post_ra>
